<compile_context>
chip_gen: v7x
topology: tpu7x:2x2x1
jax: 0.10.0
libtpu: 0.0.40
codegen_flags: <defaults>
</compile_context>

<pallas_src>
import jax
import jax.numpy as jnp
from jax import lax
from jax.experimental import pallas as pl
from jax.experimental.pallas import tpu as pltpu

LEAKY_SLOPE = 0.01   # nn.LeakyReLU default
LN_EPS = 1e-5        # nn.LayerNorm default


def _round_up(x, m):
    return ((x + m - 1) // m) * m


def _leaky_relu(x):
    return jnp.where(x >= 0, x, LEAKY_SLOPE * x)


def _layer_norm(x, gamma, beta):
    # Fused statistics: both reductions depend only on x (issued together),
    # instead of mean -> subtract -> second reduce as a serial chain.
    n = x.shape[-1]
    s1 = jnp.sum(x, axis=-1, keepdims=True)
    s2 = jnp.sum(x * x, axis=-1, keepdims=True)
    mean = s1 * (1.0 / n)
    var = s2 * (1.0 / n) - mean * mean
    inv = lax.rsqrt(var + LN_EPS)
    return (x - mean) * inv * gamma + beta


def _resmlp_kernel(
    z_ref,
    # pre_skip params
    w1_ref, b1_ref, g1_ref, be1_ref,      # Linear(dim_in, H) + LayerNorm(H)
    w2_ref, b2_ref, g2_ref, be2_ref,      # Linear(H, H)      + LayerNorm(H)
    w3_ref, b3_ref, g3_ref, be3_ref,      # Linear(H, dim_in) + LayerNorm(dim_in)
    # post_skip params
    w4_ref, b4_ref, g4_ref, be4_ref,      # Linear(dim_in, H) + LayerNorm(H)
    w5_ref, b5_ref,                       # Linear(H, dim_out)
    o_ref,
):
    z0 = z_ref[...]                       # f32 (TB, dim_in)

    def dense(x, w_ref, b_ref):
        # bf16 MXU inputs, f32 accumulation; bias add in f32.
        return (
            jnp.dot(x.astype(jnp.bfloat16), w_ref[...],
                    preferred_element_type=jnp.float32)
            + b_ref[...]
        )

    # ---- pre_skip ----
    h = _layer_norm(_leaky_relu(dense(z0, w1_ref, b1_ref)), g1_ref[...], be1_ref[...])
    # Dropout(p=0.0) -> identity
    h = _layer_norm(_leaky_relu(dense(h, w2_ref, b2_ref)), g2_ref[...], be2_ref[...])
    h = _layer_norm(dense(h, w3_ref, b3_ref), g3_ref[...], be3_ref[...])

    # ---- residual ----
    h = h + z0

    # ---- post_skip ----
    h = _layer_norm(_leaky_relu(dense(h, w4_ref, b4_ref)), g4_ref[...], be4_ref[...])
    out = dense(h, w5_ref, b5_ref)
    o_ref[...] = out.astype(o_ref.dtype)


def resmlp_forward(z0, params, *, block_b=512):
    """z0: (B, dim_in) float32. params: dict of f32 arrays (see init_params)."""
    B, dim_in = z0.shape
    H = params["w1"].shape[1]
    dim_out = params["w5"].shape[1]

    # Batch tile: multiple of 8 sublanes; pad B so every tile is full.
    TB = min(block_b, _round_up(B, 8))
    Bp = _round_up(B, TB)
    if Bp != B:
        z0 = jnp.pad(z0, ((0, Bp - B), (0, 0)))
    grid = (pl.cdiv(Bp, TB),)

    bf = jnp.bfloat16
    wargs = (
        params["w1"].astype(bf), params["b1"], params["g1"], params["be1"],
        params["w2"].astype(bf), params["b2"], params["g2"], params["be2"],
        params["w3"].astype(bf), params["b3"], params["g3"], params["be3"],
        params["w4"].astype(bf), params["b4"], params["g4"], params["be4"],
        params["w5"].astype(bf), params["b5"],
    )

    def const_spec(a):
        # Constant block index -> DMA'd once, stays resident across the grid.
        return pl.BlockSpec(a.shape, lambda i: (0, 0))

    in_specs = [pl.BlockSpec((TB, dim_in), lambda i: (i, 0))]
    in_specs += [const_spec(a) for a in wargs]
    # TODO(synk): dim_out=8 output store is lane-sparse (8/128 lanes); a
    # lane-dense padded-output variant should be benchmarked for large B.
    out_specs = pl.BlockSpec((TB, dim_out), lambda i: (i, 0))

    flops = 2 * Bp * (dim_in * H + H * H + H * dim_in + dim_in * H + H * dim_out)
    weight_bytes = sum(int(a.size) * a.dtype.itemsize for a in wargs)
    bytes_accessed = Bp * dim_in * 4 + Bp * dim_out * 4 + weight_bytes
    cost = pl.CostEstimate(
        flops=flops, transcendentals=4 * Bp, bytes_accessed=bytes_accessed
    )

    out = pl.pallas_call(
        _resmlp_kernel,
        out_shape=jax.ShapeDtypeStruct((Bp, dim_out), jnp.float32),
        grid=grid,
        in_specs=in_specs,
        out_specs=out_specs,
        compiler_params=pltpu.CompilerParams(
            dimension_semantics=("parallel",),       # megacore on v7x
            vmem_limit_bytes=32 * 1024 * 1024,       # explicit, fits 64MiB v7x
        ),
        cost_estimate=cost,
    )(z0, *wargs)
    return out[:B]


def init_params(key, dim_in, dim_out, dim_hidden):
    """Deterministic synthetic parameter init (shapes match nn.Module.__init__)."""
    ks = jax.random.split(key, 10)

    def linear(kw, kb, fan_in, fan_out):
        bound = 1.0 / jnp.sqrt(fan_in)
        w = jax.random.uniform(kw, (fan_in, fan_out), jnp.float32, -bound, bound)
        b = jax.random.uniform(kb, (1, fan_out), jnp.float32, -bound, bound)
        return w, b

    w1, b1 = linear(ks[0], ks[1], dim_in, dim_hidden)
    w2, b2 = linear(ks[2], ks[3], dim_hidden, dim_hidden)
    w3, b3 = linear(ks[4], ks[5], dim_hidden, dim_in)
    w4, b4 = linear(ks[6], ks[7], dim_in, dim_hidden)
    w5, b5 = linear(ks[8], ks[9], dim_hidden, dim_out)

    ones = lambda d: jnp.ones((1, d), jnp.float32)
    zeros = lambda d: jnp.zeros((1, d), jnp.float32)

    return dict(
        w1=w1, b1=b1, g1=ones(dim_hidden), be1=zeros(dim_hidden),
        w2=w2, b2=b2, g2=ones(dim_hidden), be2=zeros(dim_hidden),
        w3=w3, b3=b3, g3=ones(dim_in),     be3=zeros(dim_in),
        w4=w4, b4=b4, g4=ones(dim_hidden), be4=zeros(dim_hidden),
        w5=w5, b5=b5,
    )


def resmlp_reference(z0, p, matmul_dtype=jnp.float32):
    """Pure-JAX reference. matmul_dtype=bf16 mirrors the kernel's MXU path."""
    def dense(x, w, b):
        return (
            jnp.dot(x.astype(matmul_dtype), w.astype(matmul_dtype),
                    preferred_element_type=jnp.float32)
            + b
        )

    h = _layer_norm(_leaky_relu(dense(z0, p["w1"], p["b1"])), p["g1"], p["be1"])
    h = _layer_norm(_leaky_relu(dense(h, p["w2"], p["b2"])), p["g2"], p["be2"])
    h = _layer_norm(dense(h, p["w3"], p["b3"]), p["g3"], p["be3"])
    h = h + z0
    h = _layer_norm(_leaky_relu(dense(h, p["w4"], p["b4"])), p["g4"], p["be4"])
    return dense(h, p["w5"], p["b5"])


if __name__ == "__main__":
    dim_in, dim_out, dim_hidden = 16, 8, 64   # module default dim_hidden=64
    batch = 13                                # non-multiple-of-8: exercises padding

    key = jax.random.PRNGKey(0)
    k_x, k_p = jax.random.split(key)
    z0 = jax.random.normal(k_x, (batch, dim_in), jnp.float32)
    params = init_params(k_p, dim_in, dim_out, dim_hidden)

    out = resmlp_forward(z0, params)
    out = jax.block_until_ready(out)
    assert out.shape == (batch, dim_out)
    assert bool(jnp.all(jnp.isfinite(out)))

    # Tight check vs. a reference using the same bf16-matmul / f32-accum path.
    ref_bf16 = resmlp_reference(z0, params, matmul_dtype=jnp.bfloat16)
    assert jnp.allclose(out, ref_bf16, atol=1e-3, rtol=1e-3)

    # Loose check vs. the pure-f32 (PyTorch-semantics) reference.
    ref_f32 = resmlp_reference(z0, params, matmul_dtype=jnp.float32)
    assert jnp.allclose(out, ref_f32, atol=5e-2, rtol=5e-2)

    print("KERNEL_OK")
</pallas_src>

<mosaic_0001>
module attributes {stable_mosaic.version = 11 : i64} {
  func.func @_resmlp_kernel(%arg0: i32, %arg1: memref<16x16xf32, #tpu.memory_space<vmem>>, %arg2: memref<16x64xbf16, #tpu.memory_space<vmem>>, %arg3: memref<1x64xf32, #tpu.memory_space<vmem>>, %arg4: memref<1x64xf32, #tpu.memory_space<vmem>>, %arg5: memref<1x64xf32, #tpu.memory_space<vmem>>, %arg6: memref<64x64xbf16, #tpu.memory_space<vmem>>, %arg7: memref<1x64xf32, #tpu.memory_space<vmem>>, %arg8: memref<1x64xf32, #tpu.memory_space<vmem>>, %arg9: memref<1x64xf32, #tpu.memory_space<vmem>>, %arg10: memref<64x16xbf16, #tpu.memory_space<vmem>>, %arg11: memref<1x16xf32, #tpu.memory_space<vmem>>, %arg12: memref<1x16xf32, #tpu.memory_space<vmem>>, %arg13: memref<1x16xf32, #tpu.memory_space<vmem>>, %arg14: memref<16x64xbf16, #tpu.memory_space<vmem>>, %arg15: memref<1x64xf32, #tpu.memory_space<vmem>>, %arg16: memref<1x64xf32, #tpu.memory_space<vmem>>, %arg17: memref<1x64xf32, #tpu.memory_space<vmem>>, %arg18: memref<64x8xbf16, #tpu.memory_space<vmem>>, %arg19: memref<1x8xf32, #tpu.memory_space<vmem>>, %arg20: memref<16x8xf32, #tpu.memory_space<vmem>>) attributes {dimension_semantics = [#tpu.dimension_semantics<parallel>], iteration_bounds = array<i64: 1>, scalar_prefetch = 0 : i64, scratch_operands = 0 : i64, tpu.core_type = #tpu.core_type<tc>, window_params = [{transform_indices = @transform_0, window_bounds = array<i64: 16, 16>}, {pipeline_mode = #tpu.pipeline_mode<synchronous>, transform_indices = @transform_1, window_bounds = array<i64: 16, 64>}, {pipeline_mode = #tpu.pipeline_mode<synchronous>, transform_indices = @transform_2, window_bounds = array<i64: 1, 64>}, {pipeline_mode = #tpu.pipeline_mode<synchronous>, transform_indices = @transform_3, window_bounds = array<i64: 1, 64>}, {pipeline_mode = #tpu.pipeline_mode<synchronous>, transform_indices = @transform_4, window_bounds = array<i64: 1, 64>}, {pipeline_mode = #tpu.pipeline_mode<synchronous>, transform_indices = @transform_5, window_bounds = array<i64: 64, 64>}, {pipeline_mode = #tpu.pipeline_mode<synchronous>, transform_indices = @transform_6, window_bounds = array<i64: 1, 64>}, {pipeline_mode = #tpu.pipeline_mode<synchronous>, transform_indices = @transform_7, window_bounds = array<i64: 1, 64>}, {pipeline_mode = #tpu.pipeline_mode<synchronous>, transform_indices = @transform_8, window_bounds = array<i64: 1, 64>}, {pipeline_mode = #tpu.pipeline_mode<synchronous>, transform_indices = @transform_9, window_bounds = array<i64: 64, 16>}, {pipeline_mode = #tpu.pipeline_mode<synchronous>, transform_indices = @transform_10, window_bounds = array<i64: 1, 16>}, {pipeline_mode = #tpu.pipeline_mode<synchronous>, transform_indices = @transform_11, window_bounds = array<i64: 1, 16>}, {pipeline_mode = #tpu.pipeline_mode<synchronous>, transform_indices = @transform_12, window_bounds = array<i64: 1, 16>}, {pipeline_mode = #tpu.pipeline_mode<synchronous>, transform_indices = @transform_13, window_bounds = array<i64: 16, 64>}, {pipeline_mode = #tpu.pipeline_mode<synchronous>, transform_indices = @transform_14, window_bounds = array<i64: 1, 64>}, {pipeline_mode = #tpu.pipeline_mode<synchronous>, transform_indices = @transform_15, window_bounds = array<i64: 1, 64>}, {pipeline_mode = #tpu.pipeline_mode<synchronous>, transform_indices = @transform_16, window_bounds = array<i64: 1, 64>}, {pipeline_mode = #tpu.pipeline_mode<synchronous>, transform_indices = @transform_17, window_bounds = array<i64: 64, 8>}, {pipeline_mode = #tpu.pipeline_mode<synchronous>, transform_indices = @transform_18, window_bounds = array<i64: 1, 8>}, {transform_indices = @transform_19, window_bounds = array<i64: 16, 8>}]} {
    %c0 = arith.constant 0 : index
    %c0_0 = arith.constant 0 : index
    %0 = vector.load %arg1[%c0, %c0_0] : memref<16x16xf32, #tpu.memory_space<vmem>>, vector<16x16xf32>
    %1 = arith.truncf %0 : vector<16x16xf32> to vector<16x16xbf16>
    %c0_1 = arith.constant 0 : index
    %c0_2 = arith.constant 0 : index
    %2 = vector.load %arg2[%c0_1, %c0_2] : memref<16x64xbf16, #tpu.memory_space<vmem>>, vector<16x64xbf16>
    %cst = arith.constant dense<0.000000e+00> : vector<16x64xf32>
    %3 = tpu.matmul %1, %2, %cst {dimension_numbers = #tpu.dot_dimension_numbers<[1], [0], [0], [1], [0, 0, 1, 1], [], []>} : vector<16x16xbf16>, vector<16x64xbf16>, vector<16x64xf32> -> vector<16x64xf32>
    %c0_3 = arith.constant 0 : index
    %c0_4 = arith.constant 0 : index
    %4 = vector.load %arg3[%c0_3, %c0_4] : memref<1x64xf32, #tpu.memory_space<vmem>>, vector<1x64xf32>
    %5 = vector.broadcast %4 : vector<1x64xf32> to vector<16x64xf32>
    %6 = arith.addf %3, %5 : vector<16x64xf32>
    %cst_5 = arith.constant 0.000000e+00 : f32
    %7 = vector.broadcast %cst_5 : f32 to vector<16x64xf32>
    %8 = arith.cmpf oge, %6, %7 : vector<16x64xf32>
    %cst_6 = arith.constant 0.00999999977 : f32
    %9 = vector.broadcast %cst_6 : f32 to vector<16x64xf32>
    %10 = arith.mulf %9, %6 : vector<16x64xf32>
    %11 = arith.select %8, %6, %10 : vector<16x64xi1>, vector<16x64xf32>
    %c0_7 = arith.constant 0 : index
    %c0_8 = arith.constant 0 : index
    %12 = vector.load %arg4[%c0_7, %c0_8] : memref<1x64xf32, #tpu.memory_space<vmem>>, vector<1x64xf32>
    %c0_9 = arith.constant 0 : index
    %c0_10 = arith.constant 0 : index
    %13 = vector.load %arg5[%c0_9, %c0_10] : memref<1x64xf32, #tpu.memory_space<vmem>>, vector<1x64xf32>
    %cst_11 = arith.constant dense<0.000000e+00> : vector<16xf32>
    %14 = vector.multi_reduction <add>, %11, %cst_11 [1] : vector<16x64xf32> to vector<16xf32>
    %15 = vector.shape_cast %14 : vector<16xf32> to vector<16x1xf32>
    %16 = arith.mulf %11, %11 : vector<16x64xf32>
    %cst_12 = arith.constant dense<0.000000e+00> : vector<16xf32>
    %17 = vector.multi_reduction <add>, %16, %cst_12 [1] : vector<16x64xf32> to vector<16xf32>
    %18 = vector.shape_cast %17 : vector<16xf32> to vector<16x1xf32>
    %cst_13 = arith.constant 1.562500e-02 : f32
    %19 = vector.broadcast %cst_13 : f32 to vector<16x1xf32>
    %20 = arith.mulf %15, %19 : vector<16x1xf32>
    %cst_14 = arith.constant 1.562500e-02 : f32
    %21 = vector.broadcast %cst_14 : f32 to vector<16x1xf32>
    %22 = arith.mulf %18, %21 : vector<16x1xf32>
    %23 = arith.mulf %20, %20 : vector<16x1xf32>
    %24 = arith.subf %22, %23 : vector<16x1xf32>
    %cst_15 = arith.constant 9.99999974E-6 : f32
    %25 = vector.broadcast %cst_15 : f32 to vector<16x1xf32>
    %26 = arith.addf %24, %25 : vector<16x1xf32>
    %27 = math.rsqrt %26 : vector<16x1xf32>
    %28 = vector.broadcast %20 : vector<16x1xf32> to vector<16x64xf32>
    %29 = arith.subf %11, %28 : vector<16x64xf32>
    %30 = vector.broadcast %27 : vector<16x1xf32> to vector<16x64xf32>
    %31 = arith.mulf %29, %30 : vector<16x64xf32>
    %32 = vector.broadcast %12 : vector<1x64xf32> to vector<16x64xf32>
    %33 = arith.mulf %31, %32 : vector<16x64xf32>
    %34 = vector.broadcast %13 : vector<1x64xf32> to vector<16x64xf32>
    %35 = arith.addf %33, %34 : vector<16x64xf32>
    %36 = arith.truncf %35 : vector<16x64xf32> to vector<16x64xbf16>
    %c0_16 = arith.constant 0 : index
    %c0_17 = arith.constant 0 : index
    %37 = vector.load %arg6[%c0_16, %c0_17] : memref<64x64xbf16, #tpu.memory_space<vmem>>, vector<64x64xbf16>
    %cst_18 = arith.constant dense<0.000000e+00> : vector<16x64xf32>
    %38 = tpu.matmul %36, %37, %cst_18 {dimension_numbers = #tpu.dot_dimension_numbers<[1], [0], [0], [1], [0, 0, 1, 1], [], []>} : vector<16x64xbf16>, vector<64x64xbf16>, vector<16x64xf32> -> vector<16x64xf32>
    %c0_19 = arith.constant 0 : index
    %c0_20 = arith.constant 0 : index
    %39 = vector.load %arg7[%c0_19, %c0_20] : memref<1x64xf32, #tpu.memory_space<vmem>>, vector<1x64xf32>
    %40 = vector.broadcast %39 : vector<1x64xf32> to vector<16x64xf32>
    %41 = arith.addf %38, %40 : vector<16x64xf32>
    %cst_21 = arith.constant 0.000000e+00 : f32
    %42 = vector.broadcast %cst_21 : f32 to vector<16x64xf32>
    %43 = arith.cmpf oge, %41, %42 : vector<16x64xf32>
    %cst_22 = arith.constant 0.00999999977 : f32
    %44 = vector.broadcast %cst_22 : f32 to vector<16x64xf32>
    %45 = arith.mulf %44, %41 : vector<16x64xf32>
    %46 = arith.select %43, %41, %45 : vector<16x64xi1>, vector<16x64xf32>
    %c0_23 = arith.constant 0 : index
    %c0_24 = arith.constant 0 : index
    %47 = vector.load %arg8[%c0_23, %c0_24] : memref<1x64xf32, #tpu.memory_space<vmem>>, vector<1x64xf32>
    %c0_25 = arith.constant 0 : index
    %c0_26 = arith.constant 0 : index
    %48 = vector.load %arg9[%c0_25, %c0_26] : memref<1x64xf32, #tpu.memory_space<vmem>>, vector<1x64xf32>
    %cst_27 = arith.constant dense<0.000000e+00> : vector<16xf32>
    %49 = vector.multi_reduction <add>, %46, %cst_27 [1] : vector<16x64xf32> to vector<16xf32>
    %50 = vector.shape_cast %49 : vector<16xf32> to vector<16x1xf32>
    %51 = arith.mulf %46, %46 : vector<16x64xf32>
    %cst_28 = arith.constant dense<0.000000e+00> : vector<16xf32>
    %52 = vector.multi_reduction <add>, %51, %cst_28 [1] : vector<16x64xf32> to vector<16xf32>
    %53 = vector.shape_cast %52 : vector<16xf32> to vector<16x1xf32>
    %cst_29 = arith.constant 1.562500e-02 : f32
    %54 = vector.broadcast %cst_29 : f32 to vector<16x1xf32>
    %55 = arith.mulf %50, %54 : vector<16x1xf32>
    %cst_30 = arith.constant 1.562500e-02 : f32
    %56 = vector.broadcast %cst_30 : f32 to vector<16x1xf32>
    %57 = arith.mulf %53, %56 : vector<16x1xf32>
    %58 = arith.mulf %55, %55 : vector<16x1xf32>
    %59 = arith.subf %57, %58 : vector<16x1xf32>
    %cst_31 = arith.constant 9.99999974E-6 : f32
    %60 = vector.broadcast %cst_31 : f32 to vector<16x1xf32>
    %61 = arith.addf %59, %60 : vector<16x1xf32>
    %62 = math.rsqrt %61 : vector<16x1xf32>
    %63 = vector.broadcast %55 : vector<16x1xf32> to vector<16x64xf32>
    %64 = arith.subf %46, %63 : vector<16x64xf32>
    %65 = vector.broadcast %62 : vector<16x1xf32> to vector<16x64xf32>
    %66 = arith.mulf %64, %65 : vector<16x64xf32>
    %67 = vector.broadcast %47 : vector<1x64xf32> to vector<16x64xf32>
    %68 = arith.mulf %66, %67 : vector<16x64xf32>
    %69 = vector.broadcast %48 : vector<1x64xf32> to vector<16x64xf32>
    %70 = arith.addf %68, %69 : vector<16x64xf32>
    %71 = arith.truncf %70 : vector<16x64xf32> to vector<16x64xbf16>
    %c0_32 = arith.constant 0 : index
    %c0_33 = arith.constant 0 : index
    %72 = vector.load %arg10[%c0_32, %c0_33] : memref<64x16xbf16, #tpu.memory_space<vmem>>, vector<64x16xbf16>
    %cst_34 = arith.constant dense<0.000000e+00> : vector<16x16xf32>
    %73 = tpu.matmul %71, %72, %cst_34 {dimension_numbers = #tpu.dot_dimension_numbers<[1], [0], [0], [1], [0, 0, 1, 1], [], []>} : vector<16x64xbf16>, vector<64x16xbf16>, vector<16x16xf32> -> vector<16x16xf32>
    %c0_35 = arith.constant 0 : index
    %c0_36 = arith.constant 0 : index
    %74 = vector.load %arg11[%c0_35, %c0_36] : memref<1x16xf32, #tpu.memory_space<vmem>>, vector<1x16xf32>
    %75 = vector.broadcast %74 : vector<1x16xf32> to vector<16x16xf32>
    %76 = arith.addf %73, %75 : vector<16x16xf32>
    %c0_37 = arith.constant 0 : index
    %c0_38 = arith.constant 0 : index
    %77 = vector.load %arg12[%c0_37, %c0_38] : memref<1x16xf32, #tpu.memory_space<vmem>>, vector<1x16xf32>
    %c0_39 = arith.constant 0 : index
    %c0_40 = arith.constant 0 : index
    %78 = vector.load %arg13[%c0_39, %c0_40] : memref<1x16xf32, #tpu.memory_space<vmem>>, vector<1x16xf32>
    %cst_41 = arith.constant dense<0.000000e+00> : vector<16xf32>
    %79 = vector.multi_reduction <add>, %76, %cst_41 [1] : vector<16x16xf32> to vector<16xf32>
    %80 = vector.shape_cast %79 : vector<16xf32> to vector<16x1xf32>
    %81 = arith.mulf %76, %76 : vector<16x16xf32>
    %cst_42 = arith.constant dense<0.000000e+00> : vector<16xf32>
    %82 = vector.multi_reduction <add>, %81, %cst_42 [1] : vector<16x16xf32> to vector<16xf32>
    %83 = vector.shape_cast %82 : vector<16xf32> to vector<16x1xf32>
    %cst_43 = arith.constant 6.250000e-02 : f32
    %84 = vector.broadcast %cst_43 : f32 to vector<16x1xf32>
    %85 = arith.mulf %80, %84 : vector<16x1xf32>
    %cst_44 = arith.constant 6.250000e-02 : f32
    %86 = vector.broadcast %cst_44 : f32 to vector<16x1xf32>
    %87 = arith.mulf %83, %86 : vector<16x1xf32>
    %88 = arith.mulf %85, %85 : vector<16x1xf32>
    %89 = arith.subf %87, %88 : vector<16x1xf32>
    %cst_45 = arith.constant 9.99999974E-6 : f32
    %90 = vector.broadcast %cst_45 : f32 to vector<16x1xf32>
    %91 = arith.addf %89, %90 : vector<16x1xf32>
    %92 = math.rsqrt %91 : vector<16x1xf32>
    %93 = vector.broadcast %85 : vector<16x1xf32> to vector<16x16xf32>
    %94 = arith.subf %76, %93 : vector<16x16xf32>
    %95 = vector.broadcast %92 : vector<16x1xf32> to vector<16x16xf32>
    %96 = arith.mulf %94, %95 : vector<16x16xf32>
    %97 = vector.broadcast %77 : vector<1x16xf32> to vector<16x16xf32>
    %98 = arith.mulf %96, %97 : vector<16x16xf32>
    %99 = vector.broadcast %78 : vector<1x16xf32> to vector<16x16xf32>
    %100 = arith.addf %98, %99 : vector<16x16xf32>
    %101 = arith.addf %100, %0 : vector<16x16xf32>
    %102 = arith.truncf %101 : vector<16x16xf32> to vector<16x16xbf16>
    %c0_46 = arith.constant 0 : index
    %c0_47 = arith.constant 0 : index
    %103 = vector.load %arg14[%c0_46, %c0_47] : memref<16x64xbf16, #tpu.memory_space<vmem>>, vector<16x64xbf16>
    %cst_48 = arith.constant dense<0.000000e+00> : vector<16x64xf32>
    %104 = tpu.matmul %102, %103, %cst_48 {dimension_numbers = #tpu.dot_dimension_numbers<[1], [0], [0], [1], [0, 0, 1, 1], [], []>} : vector<16x16xbf16>, vector<16x64xbf16>, vector<16x64xf32> -> vector<16x64xf32>
    %c0_49 = arith.constant 0 : index
    %c0_50 = arith.constant 0 : index
    %105 = vector.load %arg15[%c0_49, %c0_50] : memref<1x64xf32, #tpu.memory_space<vmem>>, vector<1x64xf32>
    %106 = vector.broadcast %105 : vector<1x64xf32> to vector<16x64xf32>
    %107 = arith.addf %104, %106 : vector<16x64xf32>
    %cst_51 = arith.constant 0.000000e+00 : f32
    %108 = vector.broadcast %cst_51 : f32 to vector<16x64xf32>
    %109 = arith.cmpf oge, %107, %108 : vector<16x64xf32>
    %cst_52 = arith.constant 0.00999999977 : f32
    %110 = vector.broadcast %cst_52 : f32 to vector<16x64xf32>
    %111 = arith.mulf %110, %107 : vector<16x64xf32>
    %112 = arith.select %109, %107, %111 : vector<16x64xi1>, vector<16x64xf32>
    %c0_53 = arith.constant 0 : index
    %c0_54 = arith.constant 0 : index
    %113 = vector.load %arg16[%c0_53, %c0_54] : memref<1x64xf32, #tpu.memory_space<vmem>>, vector<1x64xf32>
    %c0_55 = arith.constant 0 : index
    %c0_56 = arith.constant 0 : index
    %114 = vector.load %arg17[%c0_55, %c0_56] : memref<1x64xf32, #tpu.memory_space<vmem>>, vector<1x64xf32>
    %cst_57 = arith.constant dense<0.000000e+00> : vector<16xf32>
    %115 = vector.multi_reduction <add>, %112, %cst_57 [1] : vector<16x64xf32> to vector<16xf32>
    %116 = vector.shape_cast %115 : vector<16xf32> to vector<16x1xf32>
    %117 = arith.mulf %112, %112 : vector<16x64xf32>
    %cst_58 = arith.constant dense<0.000000e+00> : vector<16xf32>
    %118 = vector.multi_reduction <add>, %117, %cst_58 [1] : vector<16x64xf32> to vector<16xf32>
    %119 = vector.shape_cast %118 : vector<16xf32> to vector<16x1xf32>
    %cst_59 = arith.constant 1.562500e-02 : f32
    %120 = vector.broadcast %cst_59 : f32 to vector<16x1xf32>
    %121 = arith.mulf %116, %120 : vector<16x1xf32>
    %cst_60 = arith.constant 1.562500e-02 : f32
    %122 = vector.broadcast %cst_60 : f32 to vector<16x1xf32>
    %123 = arith.mulf %119, %122 : vector<16x1xf32>
    %124 = arith.mulf %121, %121 : vector<16x1xf32>
    %125 = arith.subf %123, %124 : vector<16x1xf32>
    %cst_61 = arith.constant 9.99999974E-6 : f32
    %126 = vector.broadcast %cst_61 : f32 to vector<16x1xf32>
    %127 = arith.addf %125, %126 : vector<16x1xf32>
    %128 = math.rsqrt %127 : vector<16x1xf32>
    %129 = vector.broadcast %121 : vector<16x1xf32> to vector<16x64xf32>
    %130 = arith.subf %112, %129 : vector<16x64xf32>
    %131 = vector.broadcast %128 : vector<16x1xf32> to vector<16x64xf32>
    %132 = arith.mulf %130, %131 : vector<16x64xf32>
    %133 = vector.broadcast %113 : vector<1x64xf32> to vector<16x64xf32>
    %134 = arith.mulf %132, %133 : vector<16x64xf32>
    %135 = vector.broadcast %114 : vector<1x64xf32> to vector<16x64xf32>
    %136 = arith.addf %134, %135 : vector<16x64xf32>
    %137 = arith.truncf %136 : vector<16x64xf32> to vector<16x64xbf16>
    %c0_62 = arith.constant 0 : index
    %c0_63 = arith.constant 0 : index
    %138 = vector.load %arg18[%c0_62, %c0_63] : memref<64x8xbf16, #tpu.memory_space<vmem>>, vector<64x8xbf16>
    %cst_64 = arith.constant dense<0.000000e+00> : vector<16x8xf32>
    %139 = tpu.matmul %137, %138, %cst_64 {dimension_numbers = #tpu.dot_dimension_numbers<[1], [0], [0], [1], [0, 0, 1, 1], [], []>} : vector<16x64xbf16>, vector<64x8xbf16>, vector<16x8xf32> -> vector<16x8xf32>
    %c0_65 = arith.constant 0 : index
    %c0_66 = arith.constant 0 : index
    %140 = vector.load %arg19[%c0_65, %c0_66] : memref<1x8xf32, #tpu.memory_space<vmem>>, vector<1x8xf32>
    %141 = vector.broadcast %140 : vector<1x8xf32> to vector<16x8xf32>
    %142 = arith.addf %139, %141 : vector<16x8xf32>
    %c0_67 = arith.constant 0 : index
    %c0_68 = arith.constant 0 : index
    %143 = vector.load %arg20[%c0_67, %c0_68] : memref<16x8xf32, #tpu.memory_space<vmem>>, vector<16x8xf32>
    tpu.vector_store %arg20[%c0_67, %c0_68], %142 {strides = array<i32>} : memref<16x8xf32, #tpu.memory_space<vmem>>, vector<16x8xf32>,
    return
  }
  func.func @transform_0(%arg0: i32) -> (i32, i32) {
    %c0_i32 = arith.constant 0 : i32
    %c0_i32_0 = arith.constant 0 : i32
    return %arg0, %c0_i32 : i32, i32
  }
  func.func @transform_1(%arg0: i32) -> (i32, i32) {
    %c0_i32 = arith.constant 0 : i32
    %c0_i32_0 = arith.constant 0 : i32
    %c0_i32_1 = arith.constant 0 : i32
    return %c0_i32, %c0_i32_0 : i32, i32
  }
  func.func @transform_2(%arg0: i32) -> (i32, i32) {
    %c0_i32 = arith.constant 0 : i32
    %c0_i32_0 = arith.constant 0 : i32
    %c0_i32_1 = arith.constant 0 : i32
    return %c0_i32, %c0_i32_0 : i32, i32
  }
  func.func @transform_3(%arg0: i32) -> (i32, i32) {
    %c0_i32 = arith.constant 0 : i32
    %c0_i32_0 = arith.constant 0 : i32
    %c0_i32_1 = arith.constant 0 : i32
    return %c0_i32, %c0_i32_0 : i32, i32
  }
  func.func @transform_4(%arg0: i32) -> (i32, i32) {
    %c0_i32 = arith.constant 0 : i32
    %c0_i32_0 = arith.constant 0 : i32
    %c0_i32_1 = arith.constant 0 : i32
    return %c0_i32, %c0_i32_0 : i32, i32
  }
  func.func @transform_5(%arg0: i32) -> (i32, i32) {
    %c0_i32 = arith.constant 0 : i32
    %c0_i32_0 = arith.constant 0 : i32
    %c0_i32_1 = arith.constant 0 : i32
    return %c0_i32, %c0_i32_0 : i32, i32
  }
  func.func @transform_6(%arg0: i32) -> (i32, i32) {
    %c0_i32 = arith.constant 0 : i32
    %c0_i32_0 = arith.constant 0 : i32
    %c0_i32_1 = arith.constant 0 : i32
    return %c0_i32, %c0_i32_0 : i32, i32
  }
  func.func @transform_7(%arg0: i32) -> (i32, i32) {
    %c0_i32 = arith.constant 0 : i32
    %c0_i32_0 = arith.constant 0 : i32
    %c0_i32_1 = arith.constant 0 : i32
    return %c0_i32, %c0_i32_0 : i32, i32
  }
  func.func @transform_8(%arg0: i32) -> (i32, i32) {
    %c0_i32 = arith.constant 0 : i32
    %c0_i32_0 = arith.constant 0 : i32
    %c0_i32_1 = arith.constant 0 : i32
    return %c0_i32, %c0_i32_0 : i32, i32
  }
  func.func @transform_9(%arg0: i32) -> (i32, i32) {
    %c0_i32 = arith.constant 0 : i32
    %c0_i32_0 = arith.constant 0 : i32
    %c0_i32_1 = arith.constant 0 : i32
    return %c0_i32, %c0_i32_0 : i32, i32
  }
  func.func @transform_10(%arg0: i32) -> (i32, i32) {
    %c0_i32 = arith.constant 0 : i32
    %c0_i32_0 = arith.constant 0 : i32
    %c0_i32_1 = arith.constant 0 : i32
    return %c0_i32, %c0_i32_0 : i32, i32
  }
  func.func @transform_11(%arg0: i32) -> (i32, i32) {
    %c0_i32 = arith.constant 0 : i32
    %c0_i32_0 = arith.constant 0 : i32
    %c0_i32_1 = arith.constant 0 : i32
    return %c0_i32, %c0_i32_0 : i32, i32
  }
  func.func @transform_12(%arg0: i32) -> (i32, i32) {
    %c0_i32 = arith.constant 0 : i32
    %c0_i32_0 = arith.constant 0 : i32
    %c0_i32_1 = arith.constant 0 : i32
    return %c0_i32, %c0_i32_0 : i32, i32
  }
  func.func @transform_13(%arg0: i32) -> (i32, i32) {
    %c0_i32 = arith.constant 0 : i32
    %c0_i32_0 = arith.constant 0 : i32
    %c0_i32_1 = arith.constant 0 : i32
    return %c0_i32, %c0_i32_0 : i32, i32
  }
  func.func @transform_14(%arg0: i32) -> (i32, i32) {
    %c0_i32 = arith.constant 0 : i32
    %c0_i32_0 = arith.constant 0 : i32
    %c0_i32_1 = arith.constant 0 : i32
    return %c0_i32, %c0_i32_0 : i32, i32
  }
  func.func @transform_15(%arg0: i32) -> (i32, i32) {
    %c0_i32 = arith.constant 0 : i32
    %c0_i32_0 = arith.constant 0 : i32
    %c0_i32_1 = arith.constant 0 : i32
    return %c0_i32, %c0_i32_0 : i32, i32
  }
  func.func @transform_16(%arg0: i32) -> (i32, i32) {
    %c0_i32 = arith.constant 0 : i32
    %c0_i32_0 = arith.constant 0 : i32
    %c0_i32_1 = arith.constant 0 : i32
    return %c0_i32, %c0_i32_0 : i32, i32
  }
  func.func @transform_17(%arg0: i32) -> (i32, i32) {
    %c0_i32 = arith.constant 0 : i32
    %c0_i32_0 = arith.constant 0 : i32
    %c0_i32_1 = arith.constant 0 : i32
    return %c0_i32, %c0_i32_0 : i32, i32
  }
  func.func @transform_18(%arg0: i32) -> (i32, i32) {
    %c0_i32 = arith.constant 0 : i32
    %c0_i32_0 = arith.constant 0 : i32
    %c0_i32_1 = arith.constant 0 : i32
    return %c0_i32, %c0_i32_0 : i32, i32
  }
  func.func @transform_19(%arg0: i32) -> (i32, i32) {
    %c0_i32 = arith.constant 0 : i32
    %c0_i32_0 = arith.constant 0 : i32
    return %arg0, %c0_i32 : i32, i32
  }
}

</mosaic_0001>

<bundles_post_ra>
// kernel: tpu_custom_call.1
= control target key start
LH: loop header
LB: loop body
LE: loop exit
PB: predicated region body
PF: predicated region fallthrough
CT: control target
= control target key end

     0   :  { %v789_v0 = vmov 0.0   ;;  %vm790_vm0 = vmmov 0   ;;  %vm81_vm1 = vcmask 130048   ;;  %vm134_vm3 = vcmask 523264   ;;  %s1037_s1 = inlined_call_operand.vmem [shape: bf16[16,64], index: 1, kind: input, shape index: {}]   ;;  %s1038_s0 = inlined_call_operand.vmem [shape: f32[16,16], index: 0, kind: input, shape index: {}]   ;;  %s1039_s2 = inlined_call_operand.vmem [shape: f32[1,64], index: 2, kind: input, shape index: {}]   ;;  %s1040_s5 = inlined_call_operand.vmem [shape: bf16[64,64], index: 5, kind: input, shape index: {}]   ;;  %s1041_s3 = inlined_call_operand.vmem [shape: f32[1,64], index: 3, kind: input, shape index: {}]   ;;  %s1042_s4 = inlined_call_operand.vmem [shape: f32[1,64], index: 4, kind: input, shape index: {}]   ;;  %s1043_s6 = inlined_call_operand.vmem [shape: f32[1,64], index: 6, kind: input, shape index: {}]   ;;  %s1044_s9 = inlined_call_operand.vmem [shape: bf16[64,16], index: 9, kind: input, shape index: {}]   ;;  %s1045_s7 = inlined_call_operand.vmem [shape: f32[1,64], index: 7, kind: input, shape index: {}]   ;;  %s1046_s8 = inlined_call_operand.vmem [shape: f32[1,64], index: 8, kind: input, shape index: {}]   ;;  %s1047_s10 = inlined_call_operand.vmem [shape: f32[1,16], index: 10, kind: input, shape index: {}]   ;;  %s1048_s13 = inlined_call_operand.vmem [shape: bf16[16,64], index: 13, kind: input, shape index: {}]   ;;  %s1049_s11 = inlined_call_operand.vmem [shape: f32[1,16], index: 11, kind: input, shape index: {}]   ;;  %s1050_s12 = inlined_call_operand.vmem [shape: f32[1,16], index: 12, kind: input, shape index: {}]   ;;  %s1051_s14 = inlined_call_operand.vmem [shape: f32[1,64], index: 14, kind: input, shape index: {}]   ;;  %s1052_s17 = inlined_call_operand.vmem [shape: bf16[64,8], index: 17, kind: input, shape index: {}]   ;;  %s1053_s15 = inlined_call_operand.vmem [shape: f32[1,64], index: 15, kind: input, shape index: {}]   ;;  %s1054_s16 = inlined_call_operand.vmem [shape: f32[1,64], index: 16, kind: input, shape index: {}]   ;;  %s1055_s18 = inlined_call_operand.vmem [shape: f32[1,8], index: 18, kind: input, shape index: {}]   ;;  %s1056_s19 = inlined_call_operand.vmem [shape: f32[16,8], index: 19, kind: output, shape index: {}]  }
   0x1   :  { %1059 = sst [smem:[#allocation2_spill]] %s1037_s1  ;;  %709 = vmatprep.subr.bf16.mxu1 %v789_v0  ;;  %711 = vmatprep.mubr.msk.bf16.mxu1 %vm790_vm0, %v789_v0  ;;  %v661_v43 = vld [vmem:[%s1041_s3] ss:$0 sm:$0xff]  ;;  %vm651_vm9 = vcmask 64512  }
   0x2   :  { %1060 = sst [smem:[#allocation3_spill]] %s1038_s0  ;;  %s1063_s20 = sld [smem:[#allocation2_spill]]  ;;  %727 = vmatprep.subr.bf16.mxu0 %v789_v0  ;;  %735 = vmatprep.mubr.msk.bf16.mxu0 %vm790_vm0, %v789_v0  ;;  %v662_v48 = vld [vmem:[%s1042_s4] ss:$0 sm:$0xff] }
   0x3   :  { %1061 = sst [smem:[#allocation4_spill]] %s1039_s2  ;;  %s1064_s22 = sld [smem:[#allocation3_spill]]  ;;  %v663_v53 = vld [vmem:[%s1043_s6] ss:$0 sm:$0xff] }
   0x4   :  { %1062 = sst [smem:[#allocation5_spill]] %s1040_s5  ;;  %s1065_s5 = sld [smem:[#allocation4_spill]] }
   0x5   :  { %s1066_s28 = sld [smem:[#allocation5_spill]] }
   0x8   :  { %v759_v1 = vld [vmem:[%s1063_s20] sm:$0xff]  }
   0x9   :  { %v900_v2 = vld [vmem:[%s1064_s22] sm:$0xff]  ;;  %v905_v3 = vld [vmem:[%s1064_s22 + $0x8] sm:$0xff]  ;;  %710 = vmatpush3.bf16.msra.mxu1 %v759_v1 }
   0xa   :  { %v65_v4 = vpack.c.bf16 %v905_v3, %v900_v2  ;;  %715 = vmatprep.subr.bf16.mxu1 %v789_v0  ;;  %v658_v5 = vld [vmem:[%s1065_s5] ss:$0 sm:$0xff] }
   0xb   :  { %v760_v22 = vld [vmem:[%s1066_s28] sm:$0xff]   ;;  %v761_v23 = vld [vmem:[%s1066_s28 + $0x8] sm:$0xff]   ;;  %v762_v24 = vld [vmem:[%s1066_s28 + $0x10] sm:$0xff]  }
   0xc   :  { %712 = vmatmul.mubr.msk.bf16.vlgmr.msra.gmra.mrb[0].mxu1 %vm81_vm1, %v65_v4  ;;  %v763_v25 = vld [vmem:[%s1066_s28 + $0x18] sm:$0xff]  }
   0xd   :  { %723 = vmatprep.mubr.msk.bf16.mxu1 %vm790_vm0, %v789_v0  ;;  %716 = vmatpush3.bf16.msra.mxu1 %v760_v22 }
   0xe   :  { %717 = vmatprep.subr.bf16.mxu1 %v789_v0 }
  0x11   :  { %718 = vmatpush3.bf16.msra.mxu1 %v761_v23 }
  0x12   :  { %719 = vmatprep.subr.bf16.mxu1 %v789_v0 }
  0x15   :  { %720 = vmatpush3.bf16.msra.mxu1 %v762_v24 }
  0x16   :  { %721 = vmatprep.subr.bf16.mxu1 %v789_v0 }
  0x19   :  { %722 = vmatpush3.bf16.msra.mxu1 %v763_v25 }
  0x1a   :  { %739 = vmatprep.subr.bf16.mxu1 %v789_v0 }
  0xdf   :  { %v119_v6 = vpop.f32.mrb[0].mxu1 }
  0xe0   :  { %v120_v7 = vadd.f32 %v658_v5, %v119_v6  ;;  %v713_v8 = vpop.f32.mrb[1].mxu1 }
  0xe1   :  { %v122_v9 = vpop.f32.mrb[2].mxu1 }
  0xe2   :  { %v128_v10 = vmul.f32 0.01, %v120_v7  ;;  %v123_v11 = vadd.f32 %v658_v5, %v122_v9  ;;  %v714_v12 = vpop.f32.mrb[3].mxu1  ;;  %vm126_vm2 = vcmp.ge.f32.partialorder %v120_v7, 0.0  ;;  %v764_v9 = vld [vmem:[%s1044_s9] sm:$0xff]  }
  0xe3   :  { %728 = vmatpush3.bf16.msra.mxu0 %v764_v9  ;;  %v767_v12 = vld [vmem:[%s1044_s9 + $0x18] sm:$0xff]   ;;  %v677_v9 = vld [vmem:[%s1049_s11] ss:$0 sm:$0xff] }
  0xe4   :  { %v129_v13 = vmul.f32 0.01, %v123_v11  ;;  %v130_v14 = vsel %vm126_vm2, %v120_v7, %v128_v10  ;;  %vm127_vm4 = vcmp.ge.f32.partialorder %v123_v11, 0.0  ;;  %v765_v10 = vld [vmem:[%s1044_s9 + $0x8] sm:$0xff]   ;;  %729 = vmatprep.subr.bf16.mxu0 %v789_v0 }
  0xe5   :  { %v135_v15 = vsel %vm134_vm3, %v130_v14, 0.0  ;;  %v141_v16 = vmul.f32 %v130_v14, %v130_v14 }
  0xe6   :  { %136 = vadd.xlane.f32.xlu0 %v135_v15  ;;  %v131_v17 = vsel %vm127_vm4, %v123_v11, %v129_v13  ;;  %v766_v11 = vld [vmem:[%s1044_s9 + $0x10] sm:$0xff]  }
  0xe7   :  { %v143_v18 = vsel %vm134_vm3, %v141_v16, 0.0  ;;  %v142_v19 = vmul.f32 %v131_v17, %v131_v17  ;;  %v138_v20 = vsel %vm134_vm3, %v131_v17, 0.0  ;;  %730 = vmatpush3.bf16.msra.mxu0 %v765_v10 }
  0xe8   :  { %144 = vadd.xlane.f32.xlu1 %v143_v18  ;;  %731 = vmatprep.subr.bf16.mxu0 %v789_v0 }
  0xe9   :  { %v146_v21 = vsel %vm134_vm3, %v142_v19, 0.0 }
  0xea   :  { %139 = vadd.xlane.f32.xlu0 %v138_v20 }
  0xeb   :  { %732 = vmatpush3.bf16.msra.mxu0 %v766_v11 }
  0xec   :  { %147 = vadd.xlane.f32.xlu1 %v146_v21  ;;  %733 = vmatprep.subr.bf16.mxu0 %v789_v0 }
  0xef   :  { %734 = vmatpush3.bf16.msra.mxu0 %v767_v12 }
  0xf0   :  { %745 = vmatprep.subr.bf16.mxu0 %v789_v0 }
 0x173   :  { %v137_v26 = vpop.xlane.xlu0 %136 }
 0x174   :  { %v149_v27 = vmul.f32 0.015625, %v137_v26 }
 0x175   :  { %v145_v28 = vpop.xlane.xlu1 %144 }
 0x176   :  { %v153_v29 = vmul.f32 %v149_v27, %v149_v27  ;;  %v151_v30 = vmul.f32 0.015625, %v145_v28  ;;  %v161_v40 = vsub.f32 %v130_v14, %v149_v27 }
 0x177   :  { %v140_v31 = vpop.xlane.xlu0 %139 }
 0x178   :  { %v155_v32 = vsub.f32 %v151_v30, %v153_v29  ;;  %v150_v33 = vmul.f32 0.015625, %v140_v31  ;;  %v669_v29 = vld [vmem:[%s1045_s7] ss:$0 sm:$0xff] }
 0x179   :  { %v148_v34 = vpop.xlane.xlu1 %147 }
 0x17a   :  { %v157_v35 = vadd.f32 1e-05, %v155_v32  ;;  %v154_v36 = vmul.f32 %v150_v33, %v150_v33  ;;  %v152_v37 = vmul.f32 0.015625, %v148_v34  ;;  %v162_v44 = vsub.f32 %v131_v17, %v150_v33 }
 0x17c   :  { %773 = vrsqrt.f32 %v157_v35  ;;  %v156_v38 = vsub.f32 %v152_v37, %v154_v36  ;;  %v670_v35 = vld [vmem:[%s1046_s8] ss:$0 sm:$0xff] }
 0x17e   :  { %v158_v39 = vadd.f32 1e-05, %v156_v38 }
 0x180   :  { %775 = vrsqrt.f32 %v158_v39 }
 0x186   :  { %v774_v41 = vpop.eup %773 }
 0x187   :  { %v163_v42 = vmul.f32 %v774_v41, %v161_v40  ;;  %v671_v40 = vld [vmem:[%s1047_s10] ss:$0 sm:$0xff] }
 0x189   :  { %v171_v47 = vmul.f32 %v661_v43, %v163_v42 }
 0x18a   :  { %v776_v45 = vpop.eup %775 }
 0x18b   :  { %v164_v46 = vmul.f32 %v776_v45, %v162_v44  ;;  %v179_v50 = vadd.f32 %v662_v48, %v171_v47 }
 0x18d   :  { %v172_v49 = vmul.f32 %v661_v43, %v164_v46 }
 0x18f   :  { %v180_v51 = vadd.f32 %v662_v48, %v172_v49 }
 0x191   :  { %v181_v52 = vpack.c.bf16 %v180_v51, %v179_v50 }
 0x193   :  { %724 = vmatmul.mubr.msk.bf16.vlgmr.msra.gmra.mrb[4].mxu1 %vm134_vm3, %v181_v52 }
 0x194   :  { %741 = vmatprep.mubr.msk.bf16.mxu1 %vm790_vm0, %v789_v0 }
 0x266   :  { %v258_v54 = vpop.f32.mrb[4].mxu1 }
 0x267   :  { %v259_v55 = vadd.f32 %v663_v53, %v258_v54  ;;  %v725_v56 = vpop.f32.mrb[5].mxu1 }
 0x268   :  { %v261_v57 = vpop.f32.mrb[6].mxu1 }
 0x269   :  { %v267_v58 = vmul.f32 0.01, %v259_v55  ;;  %v262_v59 = vadd.f32 %v663_v53, %v261_v57  ;;  %v726_v60 = vpop.f32.mrb[7].mxu1  ;;  %vm265_vm5 = vcmp.ge.f32.partialorder %v259_v55, 0.0  ;;  %v768_v53 = vld [vmem:[%s1048_s13] sm:$0xff]  }
 0x26a   :  { %740 = vmatpush3.bf16.msra.mxu1 %v768_v53 }
 0x26b   :  { %v268_v61 = vmul.f32 0.01, %v262_v59  ;;  %v269_v62 = vsel %vm265_vm5, %v259_v55, %v267_v58  ;;  %vm266_vm6 = vcmp.ge.f32.partialorder %v262_v59, 0.0 }
 0x26c   :  { %v273_v63 = vsel %vm134_vm3, %v269_v62, 0.0  ;;  %v279_v1 = vmul.f32 %v269_v62, %v269_v62 }
 0x26d   :  { %274 = vadd.xlane.f32.xlu0 %v273_v63  ;;  %v270_v4 = vsel %vm266_vm6, %v262_v59, %v268_v61 }
 0x26e   :  { %v276_v5 = vsel %vm134_vm3, %v270_v4, 0.0  ;;  %v280_v6 = vmul.f32 %v270_v4, %v270_v4  ;;  %v281_v7 = vsel %vm134_vm3, %v279_v1, 0.0 }
 0x26f   :  { %277 = vadd.xlane.f32.xlu1 %v276_v5 }
 0x270   :  { %v284_v8 = vsel %vm134_vm3, %v280_v6, 0.0 }
 0x271   :  { %282 = vadd.xlane.f32.xlu0 %v281_v7 }
 0x273   :  { %285 = vadd.xlane.f32.xlu1 %v284_v8 }
 0x2fa   :  { %v275_v13 = vpop.xlane.xlu0 %274 }
 0x2fb   :  { %v287_v14 = vmul.f32 0.015625, %v275_v13  ;;  %v678_v13 = vld [vmem:[%s1050_s12] ss:$0 sm:$0xff] }
 0x2fc   :  { %v278_v15 = vpop.xlane.xlu1 %277 }
 0x2fd   :  { %v288_v16 = vmul.f32 0.015625, %v278_v15  ;;  %v291_v18 = vmul.f32 %v287_v14, %v287_v14  ;;  %v299_v27 = vsub.f32 %v269_v62, %v287_v14 }
 0x2fe   :  { %v283_v17 = vpop.xlane.xlu0 %282 }
 0x2ff   :  { %v289_v19 = vmul.f32 0.015625, %v283_v17  ;;  %v292_v21 = vmul.f32 %v288_v16, %v288_v16  ;;  %v300_v30 = vsub.f32 %v270_v4, %v288_v16 }
 0x300   :  { %v286_v20 = vpop.xlane.xlu1 %285 }
 0x301   :  { %v293_v22 = vsub.f32 %v289_v19, %v291_v18  ;;  %v290_v23 = vmul.f32 0.015625, %v286_v20 }
 0x303   :  { %v295_v24 = vadd.f32 1e-05, %v293_v22  ;;  %v294_v25 = vsub.f32 %v290_v23, %v292_v21  ;;  %v679_v22 = vld [vmem:[%s1051_s14] ss:$0 sm:$0xff] }
 0x305   :  { %777 = vrsqrt.f32 %v295_v24  ;;  %v296_v26 = vadd.f32 1e-05, %v294_v25 }
 0x307   :  { %779 = vrsqrt.f32 %v296_v26 }
 0x30f   :  { %v778_v28 = vpop.eup %777 }
 0x310   :  { %v301_v31 = vmul.f32 %v778_v28, %v299_v27 }
 0x311   :  { %v780_v32 = vpop.eup %779 }
 0x312   :  { %v302_v33 = vmul.f32 %v780_v32, %v300_v30  ;;  %v309_v34 = vmul.f32 %v669_v29, %v301_v31 }
 0x314   :  { %v310_v36 = vmul.f32 %v669_v29, %v302_v33  ;;  %v317_v37 = vadd.f32 %v670_v35, %v309_v34 }
 0x316   :  { %v318_v38 = vadd.f32 %v670_v35, %v310_v36 }
 0x318   :  { %v319_v39 = vpack.c.bf16 %v318_v38, %v317_v37  ;;  %v769_v37 = vld [vmem:[%s1052_s17] sm:$0xff]   ;;  %v770_v38 = vld [vmem:[%s1052_s17 + $0x8] sm:$0xff]  }
 0x31a   :  { %736 = vmatmul.mubr.msk.bf16.vlgmr.msra.gmra.mrb[0].mxu0 %vm134_vm3, %v319_v39  ;;  %v771_v39 = vld [vmem:[%s1052_s17 + $0x10] sm:$0xff]  }
 0x31b   :  { %753 = vmatprep.mubr.msk.bf16.mxu0 %vm790_vm0, %v789_v0  ;;  %746 = vmatpush3.bf16.msra.mxu0 %v769_v37 }
 0x31c   :  { %747 = vmatprep.subr.bf16.mxu0 %v789_v0 }
 0x31f   :  { %748 = vmatpush3.bf16.msra.mxu0 %v770_v38 }
 0x320   :  { %749 = vmatprep.subr.bf16.mxu0 %v789_v0 }
 0x323   :  { %750 = vmatpush3.bf16.msra.mxu0 %v771_v39 }
 0x324   :  { %751 = vmatprep.subr.bf16.mxu0 %v789_v0 }
 0x3ed   :  { %v396_v41 = vpop.f32.mrb[0].mxu0 }
 0x3ee   :  { %v397_v42 = vadd.f32 %v671_v40, %v396_v41  ;;  %v737_v43 = vpop.f32.mrb[1].mxu0 }
 0x3ef   :  { %v399_v44 = vpop.f32.mrb[2].mxu0 }
 0x3f0   :  { %v400_v45 = vadd.f32 %v671_v40, %v399_v44  ;;  %v738_v46 = vpop.f32.mrb[3].mxu0  ;;  %v405_v47 = vsel %vm81_vm1, %v397_v42, 0.0  ;;  %v411_v48 = vmul.f32 %v397_v42, %v397_v42  ;;  %v772_v40 = vld [vmem:[%s1052_s17 + $0x18] sm:$0xff]  }
 0x3f1   :  { %406 = vadd.xlane.f32.xlu0 %v405_v47  ;;  %752 = vmatpush3.bf16.msra.mxu0 %v772_v40 }
 0x3f2   :  { %v408_v49 = vsel %vm81_vm1, %v400_v45, 0.0  ;;  %v412_v50 = vmul.f32 %v400_v45, %v400_v45  ;;  %v413_v51 = vsel %vm81_vm1, %v411_v48, 0.0 }
 0x3f3   :  { %409 = vadd.xlane.f32.xlu1 %v408_v49 }
 0x3f4   :  { %v416_v52 = vsel %vm81_vm1, %v412_v50, 0.0 }
 0x3f5   :  { %414 = vadd.xlane.f32.xlu0 %v413_v51 }
 0x3f7   :  { %417 = vadd.xlane.f32.xlu1 %v416_v52 }
 0x47e   :  { %v407_v54 = vpop.xlane.xlu0 %406 }
 0x47f   :  { %v419_v55 = vmul.f32 0.0625, %v407_v54 }
 0x480   :  { %v410_v56 = vpop.xlane.xlu1 %409 }
 0x481   :  { %v420_v57 = vmul.f32 0.0625, %v410_v56  ;;  %v423_v59 = vmul.f32 %v419_v55, %v419_v55  ;;  %v431_v7 = vsub.f32 %v397_v42, %v419_v55  ;;  %v682_v56 = vld [vmem:[%s1053_s15] ss:$0 sm:$0xff] }
 0x482   :  { %v415_v58 = vpop.xlane.xlu0 %414 }
 0x483   :  { %v421_v60 = vmul.f32 0.0625, %v415_v58  ;;  %v424_v62 = vmul.f32 %v420_v57, %v420_v57  ;;  %v432_v10 = vsub.f32 %v400_v45, %v420_v57 }
 0x484   :  { %v418_v61 = vpop.xlane.xlu1 %417 }
 0x485   :  { %v425_v63 = vsub.f32 %v421_v60, %v423_v59  ;;  %v422_v1 = vmul.f32 0.0625, %v418_v61 }
 0x487   :  { %v427_v4 = vadd.f32 1e-05, %v425_v63  ;;  %v426_v5 = vsub.f32 %v422_v1, %v424_v62  ;;  %v683_v62 = vld [vmem:[%s1054_s16] ss:$0 sm:$0xff] }
 0x489   :  { %781 = vrsqrt.f32 %v427_v4  ;;  %v428_v6 = vadd.f32 1e-05, %v426_v5 }
 0x48b   :  { %783 = vrsqrt.f32 %v428_v6  ;;  %v684_v6 = vld [vmem:[%s1055_s18] ss:$0 sm:$0xff] }
 0x493   :  { %v782_v8 = vpop.eup %781 }
 0x494   :  { %v433_v11 = vmul.f32 %v782_v8, %v431_v7 }
 0x495   :  { %v784_v12 = vpop.eup %783 }
 0x496   :  { %v441_v14 = vmul.f32 %v677_v9, %v433_v11  ;;  %v434_v15 = vmul.f32 %v784_v12, %v432_v10 }
 0x498   :  { %v442_v16 = vmul.f32 %v677_v9, %v434_v15  ;;  %v449_v17 = vadd.f32 %v678_v13, %v441_v14 }
 0x49a   :  { %v450_v18 = vadd.f32 %v678_v13, %v442_v16  ;;  %v451_v19 = vadd.f32 %v449_v17, %v900_v2 }
 0x49c   :  { %v452_v20 = vadd.f32 %v450_v18, %v905_v3 }
 0x49e   :  { %v453_v21 = vpack.c.bf16 %v452_v20, %v451_v19 }
 0x4a0   :  { %742 = vmatmul.mubr.msk.bf16.vlgmr.msra.gmra.mrb[8].mxu1 %vm81_vm1, %v453_v21 }
 0x573   :  { %v506_v23 = vpop.f32.mrb[8].mxu1 }
 0x574   :  { %v507_v24 = vadd.f32 %v679_v22, %v506_v23  ;;  %v743_v25 = vpop.f32.mrb[9].mxu1 }
 0x575   :  { %v509_v26 = vpop.f32.mrb[10].mxu1 }
 0x576   :  { %v515_v27 = vmul.f32 0.01, %v507_v24  ;;  %v510_v28 = vadd.f32 %v679_v22, %v509_v26  ;;  %v744_v29 = vpop.f32.mrb[11].mxu1  ;;  %vm513_vm7 = vcmp.ge.f32.partialorder %v507_v24, 0.0 }
 0x578   :  { %v516_v30 = vmul.f32 0.01, %v510_v28  ;;  %v517_v31 = vsel %vm513_vm7, %v507_v24, %v515_v27  ;;  %vm514_vm8 = vcmp.ge.f32.partialorder %v510_v28, 0.0 }
 0x579   :  { %v521_v2 = vsel %vm134_vm3, %v517_v31, 0.0  ;;  %v527_v3 = vmul.f32 %v517_v31, %v517_v31 }
 0x57a   :  { %522 = vadd.xlane.f32.xlu0 %v521_v2  ;;  %v518_v32 = vsel %vm514_vm8, %v510_v28, %v516_v30 }
 0x57b   :  { %v524_v33 = vsel %vm134_vm3, %v518_v32, 0.0  ;;  %v528_v34 = vmul.f32 %v518_v32, %v518_v32  ;;  %v529_v35 = vsel %vm134_vm3, %v527_v3, 0.0 }
 0x57c   :  { %525 = vadd.xlane.f32.xlu1 %v524_v33 }
 0x57d   :  { %v532_v36 = vsel %vm134_vm3, %v528_v34, 0.0 }
 0x57e   :  { %530 = vadd.xlane.f32.xlu0 %v529_v35 }
 0x580   :  { %533 = vadd.xlane.f32.xlu1 %v532_v36 }
 0x607   :  { %v523_v41 = vpop.xlane.xlu0 %522 }
 0x608   :  { %v535_v42 = vmul.f32 0.015625, %v523_v41 }
 0x609   :  { %v526_v43 = vpop.xlane.xlu1 %525 }
 0x60a   :  { %v536_v44 = vmul.f32 0.015625, %v526_v43  ;;  %v539_v46 = vmul.f32 %v535_v42, %v535_v42  ;;  %v547_v54 = vsub.f32 %v517_v31, %v535_v42 }
 0x60b   :  { %v531_v45 = vpop.xlane.xlu0 %530 }
 0x60c   :  { %v537_v47 = vmul.f32 0.015625, %v531_v45  ;;  %v540_v49 = vmul.f32 %v536_v44, %v536_v44  ;;  %v548_v57 = vsub.f32 %v518_v32, %v536_v44 }
 0x60d   :  { %v534_v48 = vpop.xlane.xlu1 %533 }
 0x60e   :  { %v541_v50 = vsub.f32 %v537_v47, %v539_v46  ;;  %v538_v51 = vmul.f32 0.015625, %v534_v48 }
 0x610   :  { %v543_v52 = vadd.f32 1e-05, %v541_v50  ;;  %v542_v53 = vsub.f32 %v538_v51, %v540_v49 }
 0x612   :  { %785 = vrsqrt.f32 %v543_v52  ;;  %v544_v0 = vadd.f32 1e-05, %v542_v53 }
 0x614   :  { %787 = vrsqrt.f32 %v544_v0 }
 0x61c   :  { %v786_v55 = vpop.eup %785 }
 0x61d   :  { %v549_v58 = vmul.f32 %v786_v55, %v547_v54 }
 0x61e   :  { %v788_v59 = vpop.eup %787 }
 0x61f   :  { %v557_v60 = vmul.f32 %v682_v56, %v549_v58  ;;  %v550_v61 = vmul.f32 %v788_v59, %v548_v57 }
 0x621   :  { %v558_v63 = vmul.f32 %v682_v56, %v550_v61  ;;  %v565_v1 = vadd.f32 %v683_v62, %v557_v60 }
 0x623   :  { %v566_v4 = vadd.f32 %v683_v62, %v558_v63 }
 0x625   :  { %v567_v5 = vpack.c.bf16 %v566_v4, %v565_v1 }
 0x627   :  { %754 = vmatmul.mubr.msk.bf16.vlgmr.msra.gmra.mrb[4].mxu0 %vm134_vm3, %v567_v5 }
 0x6fa   :  { %v644_v7 = vpop.f32.mrb[4].mxu0 }
 0x6fb   :  { %v645_v8 = vadd.f32 %v684_v6, %v644_v7  ;;  %v755_v9 = vpop.f32.mrb[5].mxu0 }
 0x6fc   :  { %v647_v10 = vpop.f32.mrb[6].mxu0 }
 0x6fd   :  { %652 = vst.msk [vmem:[%s1056_s19] sm:$0xff] %vm651_vm9, %v645_v8  ;;  %v648_v11 = vadd.f32 %v684_v6, %v647_v10  ;;  %v756_v12 = vpop.f32.mrb[7].mxu0 }
 0x6ff   :  { %653 = vst.msk [vmem:[%s1056_s19 + $0x8] sm:$0xff] %vm651_vm9, %v648_v11 }

</bundles_post_ra>
